<compile_context>
chip_gen: v5e
topology: v5e:2x2
jax: 0.10.0
libtpu: 0.0.40
codegen_flags: <defaults>
</compile_context>

<pallas_src>
import jax
import jax.numpy as jnp
from jax.experimental import pallas as pl
from jax.experimental.pallas import tpu as pltpu


def _round_up(x, m):
    return ((x + m - 1) // m) * m


# ----------------------------------------------------------------------------
# Pallas kernel: one (batch, m, n) output tile accumulated over the k axis.
# Batch dim is squeezed out of the refs, so a_ref/f_ref/o_ref are 2-D tiles.
# ----------------------------------------------------------------------------
def _mean_agg_kernel(a_ref, f_ref, o_ref, acc_ref):
    # grid = (batch, m_tiles, n_tiles, k_tiles); reduction axis (k) is last.
    @pl.when(pl.program_id(3) == 0)
    def _init():
        acc_ref[...] = jnp.zeros_like(acc_ref)

    acc_ref[...] += jnp.dot(a_ref[...], f_ref[...],
                            preferred_element_type=jnp.float32)

    @pl.when(pl.program_id(3) == pl.num_programs(3) - 1)
    def _store():
        o_ref[...] = acc_ref[...].astype(o_ref.dtype)


# ----------------------------------------------------------------------------
# Wrapper: batched tiled matmul  (B, M, K) @ (B, K, N) -> (B, M, N)
# ----------------------------------------------------------------------------
def _batched_matmul(a, f, *, tm=512, tn=256, tk=256):
    B, M, K = a.shape
    _, _, N = f.shape
    out_dtype = jnp.promote_types(a.dtype, f.dtype)

    # Lane dims (tk for A, tn for F/O) must be multiples of 128; sublane dims
    # (tm, tk-as-sublane) multiples of 8.  Clip to the padded problem size so
    # small problems use a single tile per axis while big problems keep large
    # tiles (per-grid-step overhead ~0.35 us, so avoid tiny tiles).
    tm = min(tm, _round_up(M, 8))
    tk = min(tk, _round_up(K, 128))
    tn = min(tn, _round_up(N, 128))

    Mp, Kp, Np = _round_up(M, tm), _round_up(K, tk), _round_up(N, tn)
    if (Mp, Kp) != (M, K):
        a = jnp.pad(a, ((0, 0), (0, Mp - M), (0, Kp - K)))
    if (Kp, Np) != (K, N):
        f = jnp.pad(f, ((0, 0), (0, Kp - K), (0, Np - N)))

    grid = (B, Mp // tm, Np // tn, Kp // tk)

    out = pl.pallas_call(
        _mean_agg_kernel,
        out_shape=jax.ShapeDtypeStruct((B, Mp, Np), out_dtype),
        grid_spec=pltpu.PrefetchScalarGridSpec(
            num_scalar_prefetch=0,
            grid=grid,
            in_specs=[
                # batch dim squeezed (None) -> kernel sees 2-D tiles.
                pl.BlockSpec((None, tm, tk), lambda b, i, j, k: (b, i, k)),  # A
                pl.BlockSpec((None, tk, tn), lambda b, i, j, k: (b, k, j)),  # feat
            ],
            out_specs=pl.BlockSpec((None, tm, tn), lambda b, i, j, k: (b, i, j)),
            scratch_shapes=[pltpu.VMEM((tm, tn), jnp.float32)],
        ),
        compiler_params=pltpu.CompilerParams(
            dimension_semantics=("parallel", "parallel", "parallel",
                                 "arbitrary"),
            vmem_limit_bytes=64 * 1024 * 1024),
    )(a, f)

    if (Mp, Np) != (M, N):
        out = out[:, :M, :N]
    return out


# ----------------------------------------------------------------------------
# MeanAggregator.forward semantics
# ----------------------------------------------------------------------------
def mean_aggregator_forward(features, A):
    """features: (N, D) with A (N, N)  or  (B, N, D) with A (B, N, N)."""
    if features.ndim == 2:
        return _batched_matmul(A[None], features[None])[0]
    elif features.ndim == 3:
        return _batched_matmul(A, features)
    else:
        raise RuntimeError("the dimension of features should be 2 or 3")


if __name__ == "__main__":
    key = jax.random.PRNGKey(0)
    k_feat2, k_adj2, k_feat3, k_adj3 = jax.random.split(key, 4)

    # ---- 2D case: (N, D) features, (N, N) row-normalized adjacency --------
    n_nodes, nhid = 16, 32
    features_2d = jax.random.normal(k_feat2, (n_nodes, nhid), jnp.float32)
    adj = (jax.random.uniform(k_adj2, (n_nodes, n_nodes)) < 0.3).astype(jnp.float32)
    adj = adj + jnp.eye(n_nodes, dtype=jnp.float32)          # self loops
    A_2d = adj / jnp.sum(adj, axis=1, keepdims=True)          # mean aggregation

    # ---- 3D case: (B, N, D) features, (B, N, N) adjacency ------------------
    batch = 2
    features_3d = jax.random.normal(k_feat3, (batch, n_nodes, nhid), jnp.float32)
    adj3 = (jax.random.uniform(k_adj3, (batch, n_nodes, n_nodes)) < 0.3).astype(jnp.float32)
    adj3 = adj3 + jnp.eye(n_nodes, dtype=jnp.float32)[None]
    A_3d = adj3 / jnp.sum(adj3, axis=2, keepdims=True)

    fwd = jax.jit(mean_aggregator_forward)

    out_2d = fwd(features_2d, A_2d)
    out_3d = fwd(features_3d, A_3d)
    jax.block_until_ready((out_2d, out_3d))

    ref_2d = A_2d @ features_2d
    ref_3d = jnp.einsum("bij,bjd->bid", A_3d, features_3d)
    assert out_2d.shape == (n_nodes, nhid)
    assert out_3d.shape == (batch, n_nodes, nhid)
    assert jnp.allclose(out_2d, ref_2d, atol=1e-4, rtol=1e-4)
    assert jnp.allclose(out_3d, ref_3d, atol=1e-4, rtol=1e-4)

    print("KERNEL_OK")
</pallas_src>

<mosaic_0001>
module attributes {stable_mosaic.version = 11 : i64} {
  func.func @_mean_agg_kernel(%arg0: i32, %arg1: i32, %arg2: i32, %arg3: i32, %arg4: memref<1x16x128xf32, #tpu.memory_space<vmem>>, %arg5: memref<1x128x128xf32, #tpu.memory_space<vmem>>, %arg6: memref<1x16x128xf32, #tpu.memory_space<vmem>>, %arg7: memref<16x128xf32, #tpu.memory_space<vmem>>) attributes {dimension_semantics = [#tpu.dimension_semantics<parallel>, #tpu.dimension_semantics<parallel>, #tpu.dimension_semantics<parallel>, #tpu.dimension_semantics<arbitrary>], iteration_bounds = array<i64: 1, 1, 1, 1>, scalar_prefetch = 0 : i64, scratch_operands = 1 : i64, tpu.core_type = #tpu.core_type<tc>, window_params = [{transform_indices = @transform_0, window_bounds = array<i64: 1, 16, 128>}, {transform_indices = @transform_1, window_bounds = array<i64: 1, 128, 128>}, {transform_indices = @transform_2, window_bounds = array<i64: 1, 16, 128>}]} {
    %c0_i32 = arith.constant 0 : i32
    %0 = arith.cmpi eq, %arg3, %c0_i32 : i32
    %1 = arith.extui %0 : i1 to i32
    %c0_i32_0 = arith.constant 0 : i32
    %2 = arith.cmpi ne, %1, %c0_i32_0 : i32
    scf.if %2 {
      %cst_12 = arith.constant 0.000000e+00 : f32
      %14 = vector.broadcast %cst_12 : f32 to vector<16x128xf32>
      %c0_13 = arith.constant 0 : index
      %c0_14 = arith.constant 0 : index
      %15 = vector.load %arg7[%c0_13, %c0_14] : memref<16x128xf32, #tpu.memory_space<vmem>>, vector<16x128xf32>
      tpu.vector_store %arg7[%c0_13, %c0_14], %14 {strides = array<i32>} : memref<16x128xf32, #tpu.memory_space<vmem>>, vector<16x128xf32>,
    } else {
    }
    %c0 = arith.constant 0 : index
    %c0_1 = arith.constant 0 : index
    %3 = vector.load %arg7[%c0, %c0_1] : memref<16x128xf32, #tpu.memory_space<vmem>>, vector<16x128xf32>
    %c0_2 = arith.constant 0 : index
    %c0_3 = arith.constant 0 : index
    %c0_4 = arith.constant 0 : index
    %4 = vector.load %arg4[%c0_2, %c0_3, %c0_4] : memref<1x16x128xf32, #tpu.memory_space<vmem>>, vector<1x16x128xf32>
    %5 = vector.shape_cast %4 : vector<1x16x128xf32> to vector<16x128xf32>
    %c0_5 = arith.constant 0 : index
    %c0_6 = arith.constant 0 : index
    %c0_7 = arith.constant 0 : index
    %6 = vector.load %arg5[%c0_5, %c0_6, %c0_7] : memref<1x128x128xf32, #tpu.memory_space<vmem>>, vector<1x128x128xf32>
    %7 = vector.shape_cast %6 : vector<1x128x128xf32> to vector<128x128xf32>
    %cst = arith.constant dense<0.000000e+00> : vector<16x128xf32>
    %8 = tpu.matmul %5, %7, %cst {dimension_numbers = #tpu.dot_dimension_numbers<[1], [0], [0], [1], [0, 0, 1, 1], [], []>} : vector<16x128xf32>, vector<128x128xf32>, vector<16x128xf32> -> vector<16x128xf32>
    %9 = arith.addf %3, %8 : vector<16x128xf32>
    %c0_8 = arith.constant 0 : index
    %c0_9 = arith.constant 0 : index
    %10 = vector.load %arg7[%c0_8, %c0_9] : memref<16x128xf32, #tpu.memory_space<vmem>>, vector<16x128xf32>
    tpu.vector_store %arg7[%c0_8, %c0_9], %9 {strides = array<i32>} : memref<16x128xf32, #tpu.memory_space<vmem>>, vector<16x128xf32>,
    %c0_i32_10 = arith.constant 0 : i32
    %11 = arith.cmpi eq, %arg3, %c0_i32_10 : i32
    %12 = arith.extui %11 : i1 to i32
    %c0_i32_11 = arith.constant 0 : i32
    %13 = arith.cmpi ne, %12, %c0_i32_11 : i32
    scf.if %13 {
      %c0_12 = arith.constant 0 : index
      %c0_13 = arith.constant 0 : index
      %14 = vector.load %arg7[%c0_12, %c0_13] : memref<16x128xf32, #tpu.memory_space<vmem>>, vector<16x128xf32>
      %c0_14 = arith.constant 0 : index
      %c0_15 = arith.constant 0 : index
      %c0_16 = arith.constant 0 : index
      %15 = vector.load %arg6[%c0_14, %c0_15, %c0_16] : memref<1x16x128xf32, #tpu.memory_space<vmem>>, vector<1x16x128xf32>
      %16 = vector.shape_cast %15 : vector<1x16x128xf32> to vector<16x128xf32>
      %17 = vector.shape_cast %14 : vector<16x128xf32> to vector<1x16x128xf32>
      tpu.vector_store %arg6[%c0_14, %c0_15, %c0_16], %17 {strides = array<i32>} : memref<1x16x128xf32, #tpu.memory_space<vmem>>, vector<1x16x128xf32>,
    } else {
    }
    return
  }
  func.func @transform_0(%arg0: i32, %arg1: i32, %arg2: i32, %arg3: i32) -> (i32, i32, i32) {
    %c0_i32 = arith.constant 0 : i32
    return %arg0, %arg1, %arg3 : i32, i32, i32
  }
  func.func @transform_1(%arg0: i32, %arg1: i32, %arg2: i32, %arg3: i32) -> (i32, i32, i32) {
    %c0_i32 = arith.constant 0 : i32
    return %arg0, %arg3, %arg2 : i32, i32, i32
  }
  func.func @transform_2(%arg0: i32, %arg1: i32, %arg2: i32, %arg3: i32) -> (i32, i32, i32) {
    %c0_i32 = arith.constant 0 : i32
    return %arg0, %arg1, %arg2 : i32, i32, i32
  }
}

</mosaic_0001>

<bundles_post_ra>
// kernel: mean_aggregator_forward.1
= control target key start
LH: loop header
LB: loop body
LE: loop exit
PB: predicated region body
PF: predicated region fallthrough
CT: control target
= control target key end

     0   :  { %s166_s1 = inlined_call_operand.vmem [shape: f32[1,128,128], index: 1, kind: input, shape index: {}]   ;;  %s167_s0 = inlined_call_operand.vmem [shape: f32[1,16,128], index: 0, kind: input, shape index: {}]   ;;  %s168_s2 = inlined_call_operand.vmem [shape: f32[1,16,128], index: 2, kind: output, shape index: {}]  }
   0x1   :  { %v36_v0 = vld [vmem:[%s166_s1 + $0x78] sm:$0xff]  ;;  %v35_v1 = vld [vmem:[%s166_s1 + $0x70] sm:$0xff]  ;;  %v34_v2 = vld [vmem:[%s166_s1 + $0x68] sm:$0xff] }
   0x2   :  { %37 = vmatpush.msra.mxu0 %v36_v0  ;;  %75 = vmatpush.msra.mxu1 %v36_v0  ;;  %v33_v3 = vld [vmem:[%s166_s1 + $0x60] sm:$0xff]  ;;  %v32_v4 = vld [vmem:[%s166_s1 + $0x58] sm:$0xff]  ;;  %v31_v5 = vld [vmem:[%s166_s1 + $0x50] sm:$0xff] }
   0x3   :  { %v30_v6 = vld [vmem:[%s166_s1 + $0x48] sm:$0xff]  ;;  %v29_v7 = vld [vmem:[%s166_s1 + $0x40] sm:$0xff]  ;;  %v28_v8 = vld [vmem:[%s166_s1 + $0x38] sm:$0xff] }
   0x4   :  { %38 = vmatpush.msra.mxu0 %v35_v1  ;;  %76 = vmatpush.msra.mxu1 %v35_v1  ;;  %v27_v9 = vld [vmem:[%s166_s1 + $0x30] sm:$0xff]  ;;  %v26_v10 = vld [vmem:[%s166_s1 + $0x28] sm:$0xff]  ;;  %v25_v11 = vld [vmem:[%s166_s1 + $0x20] sm:$0xff] }
   0x5   :  { %v24_v12 = vld [vmem:[%s166_s1 + $0x18] sm:$0xff]  ;;  %v23_v13 = vld [vmem:[%s166_s1 + $0x10] sm:$0xff]  ;;  %v22_v14 = vld [vmem:[%s166_s1 + $0x8] sm:$0xff] }
   0x6   :  { %39 = vmatpush.msra.mxu0 %v34_v2  ;;  %77 = vmatpush.msra.mxu1 %v34_v2  ;;  %v21_v15 = vld [vmem:[%s166_s1] sm:$0xff]  ;;  %v20_v17 = vld [vmem:[%s167_s0 + $0x8] sm:$0xff] }
   0x7   :  { %v19_v16 = vld [vmem:[%s167_s0] sm:$0xff] }
   0x8   :  { %40 = vmatpush.msra.mxu0 %v33_v3  ;;  %78 = vmatpush.msra.mxu1 %v33_v3 }
   0xa   :  { %41 = vmatpush.msra.mxu0 %v32_v4  ;;  %79 = vmatpush.msra.mxu1 %v32_v4 }
   0xc   :  { %42 = vmatpush.msra.mxu0 %v31_v5  ;;  %80 = vmatpush.msra.mxu1 %v31_v5 }
   0xe   :  { %43 = vmatpush.msra.mxu0 %v30_v6  ;;  %81 = vmatpush.msra.mxu1 %v30_v6 }
  0x10   :  { %44 = vmatpush.msra.mxu0 %v29_v7  ;;  %82 = vmatpush.msra.mxu1 %v29_v7 }
  0x12   :  { %45 = vmatpush.msra.mxu0 %v28_v8  ;;  %83 = vmatpush.msra.mxu1 %v28_v8 }
  0x14   :  { %46 = vmatpush.msra.mxu0 %v27_v9  ;;  %84 = vmatpush.msra.mxu1 %v27_v9 }
  0x16   :  { %47 = vmatpush.msra.mxu0 %v26_v10  ;;  %85 = vmatpush.msra.mxu1 %v26_v10 }
  0x18   :  { %48 = vmatpush.msra.mxu0 %v25_v11  ;;  %86 = vmatpush.msra.mxu1 %v25_v11 }
  0x1a   :  { %49 = vmatpush.msra.mxu0 %v24_v12  ;;  %87 = vmatpush.msra.mxu1 %v24_v12 }
  0x1c   :  { %50 = vmatpush.msra.mxu0 %v23_v13  ;;  %88 = vmatpush.msra.mxu1 %v23_v13 }
  0x1e   :  { %51 = vmatpush.msra.mxu0 %v22_v14  ;;  %89 = vmatpush.msra.mxu1 %v22_v14 }
  0x20   :  { %52 = vmatpush.msra.mxu0 %v21_v15  ;;  %90 = vmatpush.msra.mxu1 %v21_v15 }
  0x21   :  { %53 = vmatmul.f32.vlgmr.msra.gmra.mxu0 %v19_v16  ;;  %56 = vmatmul.f32.vlgmr.msra.gmra.mxu1 %v20_v17 }
  0x9e   :  { %v54_v18 = vpop.f32.mrf.mxu0  ;;  %v57_v19 = vpop.f32.mrf.mxu1 }
  0x9f   :  { %69 = vst [vmem:[%s168_s2] sm:$0xff] %v54_v18 }
  0xa0   :  { %70 = vst [vmem:[%s168_s2 + $0x8] sm:$0xff] %v57_v19 }

</bundles_post_ra>
